<compile_context>
chip_gen: v6e
topology: v6e:2x2x1
jax: 0.10.0
libtpu: 0.0.40
codegen_flags: <defaults>
</compile_context>

<pallas_src>
import jax
import jax.numpy as jnp
from jax.experimental import pallas as pl
from jax.experimental.pallas import tpu as pltpu


def _make_layernorm_kernel(eps):
    def kernel(gb_ref, x_ref, o_ref):
        x = x_ref[...].astype(jnp.float32)            # (TR, H)
        gamma = gb_ref[0, :]                          # (H,)
        beta = gb_ref[1, :]                           # (H,)

        # Two-pass statistics: identical formulation to the PyTorch module:
        #   u = x.mean(-1); s = ((x - u) ** 2).mean(-1)
        #   y = gamma * (x - u) / sqrt(s + eps) + beta
        u = jnp.mean(x, axis=-1, keepdims=True)
        d = x - u
        s = jnp.mean(d * d, axis=-1, keepdims=True)
        inv = jax.lax.rsqrt(s + jnp.float32(eps))     # EUP rsqrt (no VALU div/sqrt)
        o_ref[...] = (gamma * (d * inv) + beta).astype(o_ref.dtype)

    return kernel


def layer_norm(x, gamma, beta, *, eps=1e-12, row_tile=1024):
    """LayerNorm over the last axis of x; semantics match the PyTorch module."""
    orig_shape = x.shape
    H = orig_shape[-1]
    x2 = x.reshape(-1, H)
    N = x2.shape[0]

    # Largest row tile that divides N (multiple of 8 sublanes, or the full row
    # count).  Bigger tiles amortize the ~0.35us per-grid-step overhead; the
    # working set of this memory-bound kernel is tiny relative to VMEM.
    tr = N if N <= row_tile else row_tile
    if N % tr != 0 or (tr % 8 != 0 and tr != N):
        tr = N
    n_tiles = N // tr

    # Pack gamma/beta into ONE grid-constant (2, H) slab: a single operand
    # window / DMA descriptor instead of two padded (1, H) ones.  It is a few
    # KiB, so the default double-buffering cost is negligible (no need for
    # pipeline_mode=pl.Buffered(1) at this size).
    gb = jnp.stack([gamma.reshape(H), beta.reshape(H)]).astype(jnp.float32)

    out = pl.pallas_call(
        _make_layernorm_kernel(eps),
        out_shape=jax.ShapeDtypeStruct((N, H), x.dtype),
        grid=(n_tiles,),
        in_specs=[
            pl.BlockSpec((2, H), lambda i: (0, 0)),    # gamma/beta (grid-constant)
            pl.BlockSpec((tr, H), lambda i: (i, 0)),   # x row tile (lane-dense)
        ],
        out_specs=pl.BlockSpec((tr, H), lambda i: (i, 0)),
        compiler_params=pltpu.CompilerParams(
            dimension_semantics=("parallel",),
            vmem_limit_bytes=48 * 1024 * 1024,
        ),
    )(gb, x2)

    return out.reshape(orig_shape)


if __name__ == "__main__":
    # Small shapes consistent with the module: (batch=2, seq=8, hidden=32).
    B, S, H = 2, 8, 32

    key = jax.random.PRNGKey(0)
    kx, kg, kb = jax.random.split(key, 3)
    # Non-zero mean / non-unit scale so the normalization actually does work.
    x = jax.random.normal(kx, (B, S, H), jnp.float32) * 2.0 + 0.5
    gamma = 1.0 + 0.1 * jax.random.normal(kg, (H,), jnp.float32)
    beta = 0.1 * jax.random.normal(kb, (H,), jnp.float32)

    out = layer_norm(x, gamma, beta)
    out = jax.block_until_ready(out)

    # Pure-JAX reference with the exact PyTorch formulation.
    u = jnp.mean(x, axis=-1, keepdims=True)
    s = jnp.mean((x - u) ** 2, axis=-1, keepdims=True)
    ref = gamma * ((x - u) / jnp.sqrt(s + 1e-12)) + beta

    assert out.shape == x.shape
    assert bool(jnp.all(jnp.isfinite(out)))
    assert bool(jnp.allclose(out, ref, rtol=1e-5, atol=1e-5))
    print("KERNEL_OK")
</pallas_src>

<mosaic_0001>
module attributes {stable_mosaic.version = 11 : i64} {
  func.func @kernel(%arg0: i32, %arg1: memref<2x32xf32, #tpu.memory_space<vmem>>, %arg2: memref<16x32xf32, #tpu.memory_space<vmem>>, %arg3: memref<16x32xf32, #tpu.memory_space<vmem>>) attributes {dimension_semantics = [#tpu.dimension_semantics<parallel>], iteration_bounds = array<i64: 1>, scalar_prefetch = 0 : i64, scratch_operands = 0 : i64, tpu.core_type = #tpu.core_type<tc>, window_params = [{pipeline_mode = #tpu.pipeline_mode<synchronous>, transform_indices = @transform_0, window_bounds = array<i64: 2, 32>}, {transform_indices = @transform_1, window_bounds = array<i64: 16, 32>}, {transform_indices = @transform_2, window_bounds = array<i64: 16, 32>}]} {
    %c0 = arith.constant 0 : index
    %c0_0 = arith.constant 0 : index
    %0 = vector.load %arg2[%c0, %c0_0] : memref<16x32xf32, #tpu.memory_space<vmem>>, vector<16x32xf32>
    %c0_1 = arith.constant 0 : index
    %c0_2 = arith.constant 0 : index
    %1 = vector.load %arg1[%c0_1, %c0_2] : memref<2x32xf32, #tpu.memory_space<vmem>>, vector<1x32xf32>
    %2 = vector.shape_cast %1 : vector<1x32xf32> to vector<32xf32>
    %c1 = arith.constant 1 : index
    %c0_3 = arith.constant 0 : index
    %3 = vector.load %arg1[%c1, %c0_3] : memref<2x32xf32, #tpu.memory_space<vmem>>, vector<1x32xf32>
    %4 = vector.shape_cast %3 : vector<1x32xf32> to vector<32xf32>
    %cst = arith.constant dense<0.000000e+00> : vector<16xf32>
    %5 = vector.multi_reduction <add>, %0, %cst [1] : vector<16x32xf32> to vector<16xf32>
    %6 = vector.shape_cast %5 : vector<16xf32> to vector<16x1xf32>
    %cst_4 = arith.constant 3.200000e+01 : f32
    %7 = vector.broadcast %cst_4 : f32 to vector<16x1xf32>
    %8 = arith.divf %6, %7 : vector<16x1xf32>
    %9 = vector.broadcast %8 : vector<16x1xf32> to vector<16x32xf32>
    %10 = arith.subf %0, %9 : vector<16x32xf32>
    %11 = arith.mulf %10, %10 : vector<16x32xf32>
    %cst_5 = arith.constant dense<0.000000e+00> : vector<16xf32>
    %12 = vector.multi_reduction <add>, %11, %cst_5 [1] : vector<16x32xf32> to vector<16xf32>
    %13 = vector.shape_cast %12 : vector<16xf32> to vector<16x1xf32>
    %cst_6 = arith.constant 3.200000e+01 : f32
    %14 = vector.broadcast %cst_6 : f32 to vector<16x1xf32>
    %15 = arith.divf %13, %14 : vector<16x1xf32>
    %cst_7 = arith.constant 9.99999996E-13 : f32
    %16 = vector.broadcast %cst_7 : f32 to vector<16x1xf32>
    %17 = arith.addf %15, %16 : vector<16x1xf32>
    %18 = math.rsqrt %17 : vector<16x1xf32>
    %19 = vector.broadcast %18 : vector<16x1xf32> to vector<16x32xf32>
    %20 = arith.mulf %10, %19 : vector<16x32xf32>
    %21 = vector.shape_cast %2 : vector<32xf32> to vector<1x32xf32>
    %22 = vector.broadcast %21 : vector<1x32xf32> to vector<16x32xf32>
    %23 = arith.mulf %22, %20 : vector<16x32xf32>
    %24 = vector.shape_cast %4 : vector<32xf32> to vector<1x32xf32>
    %25 = vector.broadcast %24 : vector<1x32xf32> to vector<16x32xf32>
    %26 = arith.addf %23, %25 : vector<16x32xf32>
    %c0_8 = arith.constant 0 : index
    %c0_9 = arith.constant 0 : index
    %27 = vector.load %arg3[%c0_8, %c0_9] : memref<16x32xf32, #tpu.memory_space<vmem>>, vector<16x32xf32>
    tpu.vector_store %arg3[%c0_8, %c0_9], %26 {strides = array<i32>} : memref<16x32xf32, #tpu.memory_space<vmem>>, vector<16x32xf32>,
    return
  }
  func.func @transform_0(%arg0: i32) -> (i32, i32) {
    %c0_i32 = arith.constant 0 : i32
    %c0_i32_0 = arith.constant 0 : i32
    %c0_i32_1 = arith.constant 0 : i32
    return %c0_i32, %c0_i32_0 : i32, i32
  }
  func.func @transform_1(%arg0: i32) -> (i32, i32) {
    %c0_i32 = arith.constant 0 : i32
    %c0_i32_0 = arith.constant 0 : i32
    return %arg0, %c0_i32 : i32, i32
  }
  func.func @transform_2(%arg0: i32) -> (i32, i32) {
    %c0_i32 = arith.constant 0 : i32
    %c0_i32_0 = arith.constant 0 : i32
    return %arg0, %c0_i32 : i32, i32
  }
}

</mosaic_0001>

<bundles_post_ra>
// kernel: tpu_custom_call.1
= control target key start
LH: loop header
LB: loop body
LE: loop exit
PB: predicated region body
PF: predicated region fallthrough
CT: control target
= control target key end

     0   :  { %7 = vsyncpa [#allocation3], 0  ;;  %s220_s0 = inlined_call_operand.hbm [shape: f32[2,32], index: 0, kind: input, shape index: {}]   ;;  %s221_s1 = inlined_call_operand.hbm [shape: f32[16,32], index: 1, kind: input, shape index: {}]   ;;  %s222_s2 = inlined_call_operand.hbm [shape: f32[16,32], index: 2, kind: output, shape index: {}]  }
   0x1   :  { %8 = vsyncpa [#allocation6], 0 }
   0x2   :  { %9 = vsyncpa [#allocation4], 0  ;;  %s179_s9 = smov [#allocation2]   ;;  %s180_s11 = smov [#allocation5]  }
   0x3   :  { %s16_s10 = sshll.u32 %s179_s9, 4  ;;  %s25_s12 = sshll.u32 %s180_s11, 4  ;;  %s17_s10 = int_to_ptr.vmem [resolvable:$true] %s16_s10  ;;  %s26_s12 = int_to_ptr.vmem [resolvable:$true] %s25_s12 }
   0x4   :  { %s121_s13 = scalar_lea.vmem %s17_s10, 32  ;;  %p126_p1 = scmp.lt.s32.totalorder %s17_s10, %s17_s10 }
   0x5   :  { %p122_p0 = scmp.ne.s32.totalorder %s17_s10, %s121_s13  ;;  %p127_p2 = scmp.lt.s32.totalorder %s121_s13, %s121_s13 }
   0x7   :  { %p128_p3 = por %p127_p2, %p126_p1 }
   0x9   :  { %p129_p4 = pnand %p128_p3, %p122_p0 }
   0xb   :  { %132 = shalt.err (!%p129_p4)
}
   0xc   :  { %19 = dma.hbm_to_vmem [thread:$0]  %s220_s0, 32, %s17_s10, [#allocation3]  }
   0xd   :  { %s141_s16 = scalar_lea.vmem %s26_s12, 256  ;;  %p146_p6 = scmp.lt.s32.totalorder %s26_s12, %s26_s12 }
   0xe   :  { %p142_p5 = scmp.ne.s32.totalorder %s26_s12, %s141_s16  ;;  %p147_p7 = scmp.lt.s32.totalorder %s141_s16, %s141_s16 }
  0x10   :  { %p148_p8 = por %p147_p7, %p146_p6 }
  0x12   :  { %p149_p9 = pnand %p148_p8, %p142_p5 }
  0x14   :  { %152 = shalt.err (!%p149_p9)
}
  0x15   :  { %s181_s17 = smov 128   ;;  %s182_s18 = smov 8  }
  0x16   :  { %31 = dma.hbm_to_vmem [thread:$0]  %s221_s1, 256, %s26_s12, [#allocation6], %s181_s17, %s181_s17, %s182_s18  }
  0x17   :  { %173 = dma.done.wait [#allocation3], 32  }
  0x18   :  { %174 = vsyncadd [#allocation3], 4294967264 }
  0x19   :  { %175 = dma.done.wait [#allocation6], 256  }
  0x1a   :  { %176 = vsyncadd [#allocation6], 4294967040  ;;  %vm42_vm0 = vcmask 261120   ;;  %v38_v0 = vld [vmem:[#allocation5] sm:$0xff]  ;;  %v39_v1 = vld [vmem:[#allocation5 + $0x8] sm:$0xff]  ;;  %s183_s0 = smov [#allocation7]  }
  0x1b   :  { %v43_v2 = vsel %vm42_vm0, %v38_v0, 0.0  ;;  %v46_v3 = vsel %vm42_vm0, %v39_v1, 0.0  ;;  %v102_v21 = vld [vmem:[#allocation2] ss:$0 sm:$0xff]  ;;  %v103_v23 = vld [vmem:[#allocation2 + $0x1] ss:$0 sm:$0xff] }
  0x1c   :  { %44 = vadd.xlane.f32.xlu0 %v43_v2  ;;  %s89_s1 = sshll.u32 %s183_s0, 4  ;;  %s90_s1 = int_to_ptr.vmem [resolvable:$true] %s89_s1 }
  0x1d   :  { %s153_s21 = scalar_lea.vmem %s90_s1, 256  ;;  %p158_p11 = scmp.lt.s32.totalorder %s90_s1, %s90_s1 }
  0x1e   :  { %p154_p10 = scmp.ne.s32.totalorder %s90_s1, %s153_s21  ;;  %p159_p12 = scmp.lt.s32.totalorder %s153_s21, %s153_s21 }
  0x20   :  { %47 = vadd.xlane.f32.xlu0 %v46_v3  ;;  %p160_p13 = por %p159_p12, %p158_p11 }
  0x22   :  { %p161_p0 = pnand %p160_p13, %p154_p10 }
  0xa5   :  { %v45_v4 = vpop.xlane.xlu0 %44 }
  0xa6   :  { %v50_v5 = vmul.f32 0.03125, %v45_v4 }
  0xa8   :  { %v52_v6 = vsub.f32 %v38_v0, %v50_v5 }
  0xa9   :  { %v48_v7 = vpop.xlane.xlu0 %47 }
  0xaa   :  { %v51_v8 = vmul.f32 0.03125, %v48_v7  ;;  %v54_v9 = vmul.f32 %v52_v6, %v52_v6 }
  0xac   :  { %v53_v10 = vsub.f32 %v39_v1, %v51_v8  ;;  %v56_v11 = vsel %vm42_vm0, %v54_v9, 0.0 }
  0xad   :  { %57 = vadd.xlane.f32.xlu1 %v56_v11 }
  0xae   :  { %v55_v12 = vmul.f32 %v53_v10, %v53_v10 }
  0xb0   :  { %v59_v13 = vsel %vm42_vm0, %v55_v12, 0.0 }
  0xb1   :  { %60 = vadd.xlane.f32.xlu1 %v59_v13 }
 0x136   :  { %v58_v14 = vpop.xlane.xlu1 %57 }
 0x137   :  { %v62_v15 = vmul.f32 0.03125, %v58_v14 }
 0x139   :  { %v64_v16 = vadd.f32 1e-12, %v62_v15 }
 0x13a   :  { %v61_v17 = vpop.xlane.xlu1 %60 }
 0x13b   :  { %109 = vrsqrt.f32 %v64_v16  ;;  %v63_v18 = vmul.f32 0.03125, %v61_v17 }
 0x13d   :  { %v65_v19 = vadd.f32 1e-12, %v63_v18 }
 0x13f   :  { %111 = vrsqrt.f32 %v65_v19 }
 0x148   :  { %v110_v20 = vpop.eup %109 }
 0x149   :  { %v68_v22 = vmul.f32 %v110_v20, %v52_v6 }
 0x14b   :  { %v74_v24 = vmul.f32 %v102_v21, %v68_v22 }
 0x14c   :  { %v112_v25 = vpop.eup %111 }
 0x14d   :  { %v69_v26 = vmul.f32 %v112_v25, %v53_v10  ;;  %v80_v27 = vadd.f32 %v103_v23, %v74_v24 }
 0x14f   :  { %v75_v28 = vmul.f32 %v102_v21, %v69_v26  ;;  %82 = vst.msk [vmem:[#allocation7] sm:$0xff] %vm42_vm0, %v80_v27 }
 0x151   :  { %v81_v29 = vadd.f32 %v103_v23, %v75_v28 }
 0x153   :  { %83 = vst.msk [vmem:[#allocation7 + $0x8] sm:$0xff] %vm42_vm0, %v81_v29 }
 0x154   :  { %164 = shalt.err (!%p161_p0)
}
 0x155   :  { %95 = dma.vmem_to_hbm [thread:$0]  %s90_s1, 256, %s222_s2, [#allocation4], %s181_s17, %s181_s17, %s182_s18  }
 0x156   :  { %177 = dma.done.wait [#allocation4], 256  }
 0x157   :  { %178 = vsyncadd [#allocation4], 4294967040 }
 0x158   :  { %99 = vsyncpa [#allocation3], 1 }
 0x159   :  { %100 = vsyncpa [#allocation6], 1 }
 0x15a   :  { %101 = vsyncpa [#allocation4], 1 }

</bundles_post_ra>
